<compile_context>
chip_gen: v6e
topology: v6e:2x2x1
jax: 0.10.0
libtpu: 0.0.40
codegen_flags: <defaults>
</compile_context>

<pallas_src>
import math

import jax
import jax.numpy as jnp
from jax.experimental import pallas as pl
from jax.experimental.pallas import tpu as pltpu

IN_DIM = 784   # fixed by the module (MNIST-flattened input)
LANE = 128
SUBLANE = 8


def _round_up(x, m):
    return (x + m - 1) // m * m


def _mlp_kernel(inv_in_scale, inv_out_scale):
    """Kernel closure with the scaling constants baked in."""

    def kernel(x_ref, w1t_ref, w2row_ref, h2_ref, h1_ref):
        j = pl.program_id(1)          # width-tile index (innermost / accumulation)
        nj = pl.num_programs(1)

        # fc1 on the MXU (bf16 or f32 inputs, f32 accumulation); 1/in_scale fused
        # on the VPU while the MXU result drains.
        h1 = jnp.dot(x_ref[...], w1t_ref[...],
                     preferred_element_type=jnp.float32) * inv_in_scale
        h1_ref[...] = h1

        # ReLU (VPU) + fc2 contribution of this width tile as a VPU multiply +
        # cross-lane reduce (XLU). A (B,tw)@(tw,1) MXU pass would only fill a
        # single result column; the VPU/XLU slots are idle under the big matmul,
        # so this is ~free.
        h1act = jnp.maximum(h1, 0.0)
        partial = jnp.sum(h1act * w2row_ref[...], axis=-1, keepdims=True)

        # h2 output block is resident across the width axis -> accumulate in place.
        @pl.when(j == 0)
        def _():
            h2_ref[...] = jnp.zeros_like(h2_ref)

        h2_ref[...] += partial

        @pl.when(j == nj - 1)
        def _():
            h2_ref[...] = h2_ref[...] * inv_out_scale

    return kernel


def mlp_forward(x, w1, w2, *, param="ntk", gam=1.0, use_bf16=True):
    """Pallas implementation of MLP.forward.

    x  : (B, 784) float32
    w1 : (w, 784) float32   -- fc1.weight (bias=False)
    w2 : (1, w)   float32   -- fc2.weight (bias=False)
    Returns (h2:(B,1), h1:(B,w), z:(w,)) matching the PyTorch module.
    """
    width = w1.shape[0]
    if param == "ntk":
        gamma = gam
        in_scale = IN_DIM ** 0.5
        out_scale = width ** 0.5 * gamma
    elif param == "mup":
        gamma = gam * width ** 0.5
        in_scale = IN_DIM ** 0.5
        out_scale = width ** 0.5 * gamma
    elif param == "sp":
        in_scale = 1.0
        out_scale = 1.0
    else:
        raise ValueError(f"unknown param {param!r}")

    B = x.shape[0]

    # ---- tile sizing --------------------------------------------------------
    try:
        kind = jax.devices()[0].device_kind.lower()
    except Exception:  # pragma: no cover - defensive; sandbox always has a TPU
        kind = ""
    tb_max = 128 if ("v5" in kind or "v4" in kind) else 256   # v5e MXU is 128x128
    tb = min(tb_max, _round_up(B, SUBLANE))
    b_pad = _round_up(B, tb)

    # Width tile: lane-dense, at most 2048 columns so W1T/h1 tiles stay small
    # enough for double-buffering even in f32 on v7x (64 MiB VMEM).
    wpad_lane = _round_up(width, LANE)
    tw = min(2048, wpad_lane)
    wpad = _round_up(width, tw)       # exact multiple of tw -> no ragged blocks

    # ---- layout prep (cheap wrapper-side weight/pad ops) ---------------------
    # Padded W1T columns / w2 entries are zero, so they contribute nothing to h2
    # and the extra h1 columns are sliced off below.
    w1t = jnp.zeros((IN_DIM, wpad), jnp.float32).at[:, :width].set(w1.T)
    w2row = jnp.zeros((1, wpad), jnp.float32).at[:, :width].set(w2)

    in_dtype = jnp.bfloat16 if use_bf16 else jnp.float32
    x_in = x.astype(in_dtype)
    w1t = w1t.astype(in_dtype)

    if b_pad != B:
        x_in = jnp.zeros((b_pad, IN_DIM), in_dtype).at[:B].set(x_in)

    grid = (b_pad // tb, wpad // tw)

    # ---- explicit VMEM budget ------------------------------------------------
    item_in = jnp.dtype(in_dtype).itemsize
    vmem_est = 2 * (tb * IN_DIM * item_in        # x tile (double-buffered)
                    + IN_DIM * tw * item_in      # W1T tile
                    + tw * 4                     # w2 row tile
                    + tb * tw * 4                # h1 tile
                    + tb * LANE * 4)             # h2 tile (lane-padded internally)
    vmem_limit = int(min(max(2 * vmem_est, 16 << 20), 64 << 20))

    bytes_accessed = (b_pad * IN_DIM * item_in            # x
                      + grid[0] * IN_DIM * wpad * item_in  # W1T (re-read per batch tile)
                      + grid[0] * wpad * 4                 # w2 row
                      + b_pad * wpad * 4                   # h1 out
                      + b_pad * 4)                         # h2 out
    cost = pl.CostEstimate(flops=2 * b_pad * IN_DIM * wpad + 3 * b_pad * wpad,
                           transcendentals=0,
                           bytes_accessed=bytes_accessed)

    h2_p, h1_p = pl.pallas_call(
        _mlp_kernel(1.0 / in_scale, 1.0 / out_scale),
        out_shape=(
            jax.ShapeDtypeStruct((b_pad, 1), jnp.float32),       # h2
            jax.ShapeDtypeStruct((b_pad, wpad), jnp.float32),    # h1 (pre-activation)
        ),
        grid_spec=pltpu.PrefetchScalarGridSpec(
            num_scalar_prefetch=0,
            grid=grid,
            in_specs=[
                pl.BlockSpec((tb, IN_DIM), lambda i, j: (i, 0)),   # x: constant over j
                pl.BlockSpec((IN_DIM, tw), lambda i, j: (0, j)),   # W1T width tile
                pl.BlockSpec((1, tw), lambda i, j: (0, j)),        # w2 row width tile
            ],
            out_specs=[
                pl.BlockSpec((tb, 1), lambda i, j: (i, 0)),        # h2: accumulator
                pl.BlockSpec((tb, tw), lambda i, j: (i, j)),       # h1
            ],
        ),
        compiler_params=pltpu.CompilerParams(
            dimension_semantics=("parallel", "arbitrary"),   # batch megacore-sharded
            vmem_limit_bytes=vmem_limit),
        cost_estimate=cost,
    )(x_in, w1t, w2row)

    h2 = h2_p[:B]
    h1 = h1_p[:B, :width]

    # z = torch.sum(fc2.weight.T, dim=1): W2.T is (w,1), so the sum just squeezes
    # the singleton axis -> exactly W2[0, :]. (detach/clone are no-ops in JAX.)
    z = w2[0, :]

    return h2, h1, z


if __name__ == "__main__":
    key = jax.random.PRNGKey(0)
    kx, k1, k2 = jax.random.split(key, 3)

    B = 8          # batch
    width = 32     # hidden width w

    x = jax.random.normal(kx, (B, IN_DIM), dtype=jnp.float32)
    # Deterministic parameter init mimicking nn.Linear's uniform(-1/sqrt(fan_in), +)
    bound1 = 1.0 / math.sqrt(IN_DIM)
    bound2 = 1.0 / math.sqrt(width)
    w1 = jax.random.uniform(k1, (width, IN_DIM), jnp.float32, -bound1, bound1)
    w2 = jax.random.uniform(k2, (1, width), jnp.float32, -bound2, bound2)

    # Pure-JAX reference of the PyTorch math.
    in_scale = IN_DIM ** 0.5
    out_scale = width ** 0.5 * 1.0
    h1_ref = (x @ w1.T) / in_scale
    h2_ref = (jnp.maximum(h1_ref, 0.0) @ w2.T) / out_scale
    z_ref = jnp.sum(w2.T, axis=1)

    # Exact f32 path.
    h2_f32, h1_f32, z_f32 = mlp_forward(x, w1, w2, param="ntk", gam=1.0, use_bf16=False)
    jax.block_until_ready((h2_f32, h1_f32, z_f32))
    assert jnp.allclose(h1_f32, h1_ref, atol=1e-4, rtol=1e-4)
    assert jnp.allclose(h2_f32, h2_ref, atol=1e-4, rtol=1e-4)
    assert jnp.allclose(z_f32, z_ref)

    # Fast bf16-weight path (f32 accumulation) — default.
    h2_bf, h1_bf, z_bf = mlp_forward(x, w1, w2, param="ntk", gam=1.0, use_bf16=True)
    jax.block_until_ready((h2_bf, h1_bf, z_bf))
    assert jnp.allclose(h1_bf, h1_ref, atol=2e-3, rtol=2e-2)
    assert jnp.allclose(h2_bf, h2_ref, atol=2e-3, rtol=2e-2)
    assert jnp.allclose(z_bf, z_ref)

    print("KERNEL_OK")
</pallas_src>

<mosaic_0001>
module attributes {stable_mosaic.version = 11 : i64} {
  func.func @kernel(%arg0: i32, %arg1: i32, %arg2: memref<8x784xf32, #tpu.memory_space<vmem>>, %arg3: memref<784x128xf32, #tpu.memory_space<vmem>>, %arg4: memref<1x128xf32, #tpu.memory_space<vmem>>, %arg5: memref<8x1xf32, #tpu.memory_space<vmem>>, %arg6: memref<8x128xf32, #tpu.memory_space<vmem>>) attributes {dimension_semantics = [#tpu.dimension_semantics<parallel>, #tpu.dimension_semantics<arbitrary>], iteration_bounds = array<i64: 1, 1>, scalar_prefetch = 0 : i64, scratch_operands = 0 : i64, tpu.core_type = #tpu.core_type<tc>, window_params = [{transform_indices = @transform_0, window_bounds = array<i64: 8, 784>}, {transform_indices = @transform_1, window_bounds = array<i64: 784, 128>}, {transform_indices = @transform_2, window_bounds = array<i64: 1, 128>}, {transform_indices = @transform_3, window_bounds = array<i64: 8, 1>}, {transform_indices = @transform_4, window_bounds = array<i64: 8, 128>}]} {
    %c0 = arith.constant 0 : index
    %c0_0 = arith.constant 0 : index
    %0 = vector.load %arg2[%c0, %c0_0] : memref<8x784xf32, #tpu.memory_space<vmem>>, vector<8x784xf32>
    %c0_1 = arith.constant 0 : index
    %c0_2 = arith.constant 0 : index
    %1 = vector.load %arg3[%c0_1, %c0_2] : memref<784x128xf32, #tpu.memory_space<vmem>>, vector<784x128xf32>
    %cst = arith.constant dense<0.000000e+00> : vector<8x128xf32>
    %2 = tpu.matmul %0, %1, %cst {dimension_numbers = #tpu.dot_dimension_numbers<[1], [0], [0], [1], [0, 0, 1, 1], [], []>} : vector<8x784xf32>, vector<784x128xf32>, vector<8x128xf32> -> vector<8x128xf32>
    %cst_3 = arith.constant 0.0357142873 : f32
    %3 = vector.broadcast %cst_3 : f32 to vector<8x128xf32>
    %4 = arith.mulf %2, %3 : vector<8x128xf32>
    %c0_4 = arith.constant 0 : index
    %c0_5 = arith.constant 0 : index
    %5 = vector.load %arg6[%c0_4, %c0_5] : memref<8x128xf32, #tpu.memory_space<vmem>>, vector<8x128xf32>
    tpu.vector_store %arg6[%c0_4, %c0_5], %4 {strides = array<i32>} : memref<8x128xf32, #tpu.memory_space<vmem>>, vector<8x128xf32>,
    %cst_6 = arith.constant 0.000000e+00 : f32
    %6 = vector.broadcast %cst_6 : f32 to vector<8x128xf32>
    %7 = arith.maximumf %4, %6 : vector<8x128xf32>
    %c0_7 = arith.constant 0 : index
    %c0_8 = arith.constant 0 : index
    %8 = vector.load %arg4[%c0_7, %c0_8] : memref<1x128xf32, #tpu.memory_space<vmem>>, vector<1x128xf32>
    %9 = vector.broadcast %8 : vector<1x128xf32> to vector<8x128xf32>
    %10 = arith.mulf %7, %9 : vector<8x128xf32>
    %cst_9 = arith.constant dense<0.000000e+00> : vector<8xf32>
    %11 = vector.multi_reduction <add>, %10, %cst_9 [1] : vector<8x128xf32> to vector<8xf32>
    %12 = vector.shape_cast %11 : vector<8xf32> to vector<8x1xf32>
    %c0_i32 = arith.constant 0 : i32
    %13 = arith.cmpi eq, %arg1, %c0_i32 : i32
    %14 = arith.extui %13 : i1 to i32
    %c0_i32_10 = arith.constant 0 : i32
    %15 = arith.cmpi ne, %14, %c0_i32_10 : i32
    scf.if %15 {
      %cst_17 = arith.constant 0.000000e+00 : f32
      %22 = vector.broadcast %cst_17 : f32 to vector<8x1xf32>
      %c0_18 = arith.constant 0 : index
      %c0_19 = arith.constant 0 : index
      %23 = vector.load %arg5[%c0_18, %c0_19] : memref<8x1xf32, #tpu.memory_space<vmem>>, vector<8x1xf32>
      tpu.vector_store %arg5[%c0_18, %c0_19], %22 {strides = array<i32>} : memref<8x1xf32, #tpu.memory_space<vmem>>, vector<8x1xf32>,
    } else {
    }
    %c0_11 = arith.constant 0 : index
    %c0_12 = arith.constant 0 : index
    %16 = vector.load %arg5[%c0_11, %c0_12] : memref<8x1xf32, #tpu.memory_space<vmem>>, vector<8x1xf32>
    %17 = arith.addf %16, %12 : vector<8x1xf32>
    %c0_13 = arith.constant 0 : index
    %c0_14 = arith.constant 0 : index
    %18 = vector.load %arg5[%c0_13, %c0_14] : memref<8x1xf32, #tpu.memory_space<vmem>>, vector<8x1xf32>
    tpu.vector_store %arg5[%c0_13, %c0_14], %17 {strides = array<i32>} : memref<8x1xf32, #tpu.memory_space<vmem>>, vector<8x1xf32>,
    %c0_i32_15 = arith.constant 0 : i32
    %19 = arith.cmpi eq, %arg1, %c0_i32_15 : i32
    %20 = arith.extui %19 : i1 to i32
    %c0_i32_16 = arith.constant 0 : i32
    %21 = arith.cmpi ne, %20, %c0_i32_16 : i32
    scf.if %21 {
      %c0_17 = arith.constant 0 : index
      %c0_18 = arith.constant 0 : index
      %22 = vector.load %arg5[%c0_17, %c0_18] : memref<8x1xf32, #tpu.memory_space<vmem>>, vector<8x1xf32>
      %cst_19 = arith.constant 0.176776692 : f32
      %23 = vector.broadcast %cst_19 : f32 to vector<8x1xf32>
      %24 = arith.mulf %22, %23 : vector<8x1xf32>
      %c0_20 = arith.constant 0 : index
      %c0_21 = arith.constant 0 : index
      %25 = vector.load %arg5[%c0_20, %c0_21] : memref<8x1xf32, #tpu.memory_space<vmem>>, vector<8x1xf32>
      tpu.vector_store %arg5[%c0_20, %c0_21], %24 {strides = array<i32>} : memref<8x1xf32, #tpu.memory_space<vmem>>, vector<8x1xf32>,
    } else {
    }
    return
  }
  func.func @transform_0(%arg0: i32, %arg1: i32) -> (i32, i32) {
    %c0_i32 = arith.constant 0 : i32
    %c0_i32_0 = arith.constant 0 : i32
    return %arg0, %c0_i32 : i32, i32
  }
  func.func @transform_1(%arg0: i32, %arg1: i32) -> (i32, i32) {
    %c0_i32 = arith.constant 0 : i32
    %c0_i32_0 = arith.constant 0 : i32
    return %c0_i32, %arg1 : i32, i32
  }
  func.func @transform_2(%arg0: i32, %arg1: i32) -> (i32, i32) {
    %c0_i32 = arith.constant 0 : i32
    %c0_i32_0 = arith.constant 0 : i32
    return %c0_i32, %arg1 : i32, i32
  }
  func.func @transform_3(%arg0: i32, %arg1: i32) -> (i32, i32) {
    %c0_i32 = arith.constant 0 : i32
    %c0_i32_0 = arith.constant 0 : i32
    return %arg0, %c0_i32 : i32, i32
  }
  func.func @transform_4(%arg0: i32, %arg1: i32) -> (i32, i32) {
    %c0_i32 = arith.constant 0 : i32
    return %arg0, %arg1 : i32, i32
  }
}

</mosaic_0001>

<bundles_post_ra>
// kernel: tpu_custom_call.1
= control target key start
LH: loop header
LB: loop body
LE: loop exit
PB: predicated region body
PF: predicated region fallthrough
CT: control target
= control target key end

     0   :  { %10 = vsyncpa [#allocation3], 0  ;;  %s737_s0 = inlined_call_operand.hbm [shape: f32[8,784], index: 0, kind: input, shape index: {}]   ;;  %s738_s1 = inlined_call_operand.hbm [shape: f32[784,128], index: 1, kind: input, shape index: {}]   ;;  %s739_s2 = inlined_call_operand.vmem [shape: f32[1,128], index: 2, kind: input, shape index: {}]   ;;  %s740_s3 = inlined_call_operand.vmem [shape: f32[8,1], index: 3, kind: output, shape index: {0}]   ;;  %s741_s4 = inlined_call_operand.hbm [shape: f32[8,128], index: 4, kind: output, shape index: {1}]  }
   0x1   :  { %11 = vsyncpa [#allocation6], 0 }
   0x2   :  { %12 = vsyncpa [#allocation4], 0  ;;  %s671_s15 = smov [#allocation2]   ;;  %s672_s17 = smov [#allocation5]  }
   0x3   :  { %s19_s16 = sshll.u32 %s671_s15, 4  ;;  %s28_s18 = sshll.u32 %s672_s17, 4  ;;  %s20_s16 = int_to_ptr.vmem [resolvable:$true] %s19_s16  ;;  %s29_s18 = int_to_ptr.vmem [resolvable:$true] %s28_s18 }
   0x4   :  { %s613_s19 = scalar_lea.vmem %s20_s16, 896  ;;  %p618_p1 = scmp.lt.s32.totalorder %s20_s16, %s20_s16 }
   0x5   :  { %p614_p0 = scmp.ne.s32.totalorder %s20_s16, %s613_s19  ;;  %p619_p2 = scmp.lt.s32.totalorder %s613_s19, %s613_s19 }
   0x7   :  { %p620_p3 = por %p619_p2, %p618_p1 }
   0x9   :  { %p621_p4 = pnand %p620_p3, %p614_p0 }
   0xb   :  { %624 = shalt.err (!%p621_p4)
}
   0xc   :  { %22 = dma.hbm_to_vmem [thread:$0]  %s737_s0, 896, %s20_s16, [#allocation3]  }
   0xd   :  { %s633_s22 = scalar_lea.vmem %s29_s18, 12544  ;;  %p638_p6 = scmp.lt.s32.totalorder %s29_s18, %s29_s18 }
   0xe   :  { %p634_p5 = scmp.ne.s32.totalorder %s29_s18, %s633_s22  ;;  %p639_p7 = scmp.lt.s32.totalorder %s633_s22, %s633_s22 }
  0x10   :  { %p640_p8 = por %p639_p7, %p638_p6 }
  0x12   :  { %p641_p9 = pnand %p640_p8, %p634_p5 }
  0x14   :  { %644 = shalt.err (!%p641_p9)
}
  0x15   :  { %s673_s23 = smov 128   ;;  %s674_s24 = smov 8  }
  0x16   :  { %34 = dma.hbm_to_vmem [thread:$0]  %s738_s1, 12544, %s29_s18, [#allocation6], %s673_s23, %s673_s23, %s674_s24  }
  0x17   :  { %665 = dma.done.wait [#allocation3], 896  }
  0x18   :  { %666 = vsyncadd [#allocation3], 4294966400 }
  0x19   :  { %667 = dma.done.wait [#allocation6], 12544  }
  0x1a   :  { %668 = vsyncadd [#allocation6], 4294954752  ;;  %vm449_vm0 = vcmask 7168   ;;  %v675_v0 = vmov 0.0   ;;  %v81_v1 = vld [vmem:[#allocation5 + $0xf8] sm:$0xff]  ;;  %v80_v5 = vld [vmem:[#allocation5 + $0xf0] sm:$0xff] }
  0x1b   :  { %450 = vst.msk [vmem:[%s740_s3] sm:$0xff] %vm449_vm0, %v675_v0  ;;  %v113_v2 = vld [vmem:[#allocation5 + $0x1f8] sm:$0xff]  ;;  %483 = vmatprep.subr.mxu0 %v81_v1  ;;  %v112_v6 = vld [vmem:[#allocation5 + $0x1f0] sm:$0xff]  ;;  %v79_v9 = vld [vmem:[#allocation5 + $0xe8] sm:$0xff]  ;;  %vm148_vm1 = vcmask 130048   ;;  %vm676_vm2 = vmmov 0  }
  0x1c   :  { %v65_v3 = vld [vmem:[#allocation5 + $0x78] sm:$0xff]  ;;  %518 = vmatprep.subr.mxu1 %v113_v2  ;;  %v64_v7 = vld [vmem:[#allocation5 + $0x70] sm:$0xff]  ;;  %v111_v10 = vld [vmem:[#allocation5 + $0x1e8] sm:$0xff]  ;;  %s677_s29 = smov [#allocation7]  }
  0x1d   :  { %v97_v4 = vld [vmem:[#allocation5 + $0x178] sm:$0xff]  ;;  %484 = vmatpush3.msra.mxu0 %v65_v3  ;;  %v96_v8 = vld [vmem:[#allocation5 + $0x170] sm:$0xff]  ;;  %v63_v11 = vld [vmem:[#allocation5 + $0x68] sm:$0xff]  ;;  %s469_s30 = sshll.u32 %s677_s29, 4  ;;  %s470_s30 = int_to_ptr.vmem [resolvable:$true] %s469_s30 }
  0x1e   :  { %519 = vmatpush3.msra.mxu1 %v97_v4  ;;  %485 = vmatprep.subr.mxu0 %v80_v5  ;;  %v95_v12 = vld [vmem:[#allocation5 + $0x168] sm:$0xff]  ;;  %v78_v13 = vld [vmem:[#allocation5 + $0xe0] sm:$0xff]  ;;  %v77_v17 = vld [vmem:[#allocation5 + $0xd8] sm:$0xff]  ;;  %s645_s5 = scalar_lea.vmem %s470_s30, 128  ;;  %p650_p11 = scmp.lt.s32.totalorder %s470_s30, %s470_s30 }
  0x1f   :  { %520 = vmatprep.subr.mxu1 %v112_v6  ;;  %486 = vmatpush3.msra.mxu0 %v64_v7  ;;  %v110_v14 = vld [vmem:[#allocation5 + $0x1e0] sm:$0xff]  ;;  %v109_v18 = vld [vmem:[#allocation5 + $0x1d8] sm:$0xff]  ;;  %v76_v21 = vld [vmem:[#allocation5 + $0xd0] sm:$0xff]  ;;  %p646_p10 = scmp.ne.s32.totalorder %s470_s30, %s645_s5  ;;  %p651_p12 = scmp.lt.s32.totalorder %s645_s5, %s645_s5 }
  0x20   :  { %521 = vmatpush3.msra.mxu1 %v96_v8  ;;  %487 = vmatprep.subr.mxu0 %v79_v9  ;;  %v62_v15 = vld [vmem:[#allocation5 + $0x60] sm:$0xff]  ;;  %v61_v19 = vld [vmem:[#allocation5 + $0x58] sm:$0xff]  ;;  %v108_v22 = vld [vmem:[#allocation5 + $0x1d0] sm:$0xff] }
  0x21   :  { %522 = vmatprep.subr.mxu1 %v111_v10  ;;  %v94_v16 = vld [vmem:[#allocation5 + $0x160] sm:$0xff]  ;;  %488 = vmatpush3.msra.mxu0 %v63_v11  ;;  %v93_v20 = vld [vmem:[#allocation5 + $0x158] sm:$0xff]  ;;  %v60_v23 = vld [vmem:[#allocation5 + $0x50] sm:$0xff]  ;;  %p652_p13 = por %p651_p12, %p650_p11 }
  0x22   :  { %523 = vmatpush3.msra.mxu1 %v95_v12  ;;  %489 = vmatprep.subr.mxu0 %v78_v13  ;;  %v92_v24 = vld [vmem:[#allocation5 + $0x150] sm:$0xff]  ;;  %v75_v25 = vld [vmem:[#allocation5 + $0xc8] sm:$0xff]  ;;  %v74_v29 = vld [vmem:[#allocation5 + $0xc0] sm:$0xff] }
  0x23   :  { %524 = vmatprep.subr.mxu1 %v110_v14  ;;  %490 = vmatpush3.msra.mxu0 %v62_v15  ;;  %v107_v26 = vld [vmem:[#allocation5 + $0x1c8] sm:$0xff]  ;;  %v106_v30 = vld [vmem:[#allocation5 + $0x1c0] sm:$0xff]  ;;  %v73_v33 = vld [vmem:[#allocation5 + $0xb8] sm:$0xff]  ;;  %p653_p0 = pnand %p652_p13, %p646_p10 }
  0x24   :  { %525 = vmatpush3.msra.mxu1 %v94_v16  ;;  %491 = vmatprep.subr.mxu0 %v77_v17  ;;  %v59_v27 = vld [vmem:[#allocation5 + $0x48] sm:$0xff]  ;;  %v58_v31 = vld [vmem:[#allocation5 + $0x40] sm:$0xff]  ;;  %v105_v34 = vld [vmem:[#allocation5 + $0x1b8] sm:$0xff] }
  0x25   :  { %526 = vmatprep.subr.mxu1 %v109_v18  ;;  %492 = vmatpush3.msra.mxu0 %v61_v19  ;;  %v91_v28 = vld [vmem:[#allocation5 + $0x148] sm:$0xff]  ;;  %v90_v32 = vld [vmem:[#allocation5 + $0x140] sm:$0xff]  ;;  %v57_v35 = vld [vmem:[#allocation5 + $0x38] sm:$0xff] }
  0x26   :  { %527 = vmatpush3.msra.mxu1 %v93_v20  ;;  %493 = vmatprep.subr.mxu0 %v76_v21  ;;  %v89_v36 = vld [vmem:[#allocation5 + $0x138] sm:$0xff]  ;;  %v72_v37 = vld [vmem:[#allocation5 + $0xb0] sm:$0xff]  ;;  %v71_v41 = vld [vmem:[#allocation5 + $0xa8] sm:$0xff] }
  0x27   :  { %528 = vmatprep.subr.mxu1 %v108_v22  ;;  %494 = vmatpush3.msra.mxu0 %v60_v23  ;;  %v104_v38 = vld [vmem:[#allocation5 + $0x1b0] sm:$0xff]  ;;  %v103_v42 = vld [vmem:[#allocation5 + $0x1a8] sm:$0xff]  ;;  %v70_v45 = vld [vmem:[#allocation5 + $0xa0] sm:$0xff] }
  0x28   :  { %529 = vmatpush3.msra.mxu1 %v92_v24  ;;  %495 = vmatprep.subr.mxu0 %v75_v25  ;;  %v56_v39 = vld [vmem:[#allocation5 + $0x30] sm:$0xff]  ;;  %v55_v43 = vld [vmem:[#allocation5 + $0x28] sm:$0xff]  ;;  %v102_v46 = vld [vmem:[#allocation5 + $0x1a0] sm:$0xff] }
  0x29   :  { %530 = vmatprep.subr.mxu1 %v107_v26  ;;  %496 = vmatpush3.msra.mxu0 %v59_v27  ;;  %v88_v40 = vld [vmem:[#allocation5 + $0x130] sm:$0xff]  ;;  %v87_v44 = vld [vmem:[#allocation5 + $0x128] sm:$0xff]  ;;  %v54_v47 = vld [vmem:[#allocation5 + $0x20] sm:$0xff] }
  0x2a   :  { %531 = vmatpush3.msra.mxu1 %v91_v28  ;;  %497 = vmatprep.subr.mxu0 %v74_v29  ;;  %v86_v48 = vld [vmem:[#allocation5 + $0x120] sm:$0xff]  ;;  %v69_v49 = vld [vmem:[#allocation5 + $0x98] sm:$0xff]  ;;  %v68_v53 = vld [vmem:[#allocation5 + $0x90] sm:$0xff] }
  0x2b   :  { %532 = vmatprep.subr.mxu1 %v106_v30  ;;  %498 = vmatpush3.msra.mxu0 %v58_v31  ;;  %v101_v50 = vld [vmem:[#allocation5 + $0x198] sm:$0xff]  ;;  %v100_v54 = vld [vmem:[#allocation5 + $0x190] sm:$0xff]  ;;  %v67_v57 = vld [vmem:[#allocation5 + $0x88] sm:$0xff] }
  0x2c   :  { %533 = vmatpush3.msra.mxu1 %v90_v32  ;;  %499 = vmatprep.subr.mxu0 %v73_v33  ;;  %v53_v51 = vld [vmem:[#allocation5 + $0x18] sm:$0xff]  ;;  %v52_v55 = vld [vmem:[#allocation5 + $0x10] sm:$0xff]  ;;  %v99_v58 = vld [vmem:[#allocation5 + $0x188] sm:$0xff] }
  0x2d   :  { %534 = vmatprep.subr.mxu1 %v105_v34  ;;  %500 = vmatpush3.msra.mxu0 %v57_v35  ;;  %v85_v52 = vld [vmem:[#allocation5 + $0x118] sm:$0xff]  ;;  %v84_v56 = vld [vmem:[#allocation5 + $0x110] sm:$0xff]  ;;  %v51_v59 = vld [vmem:[#allocation5 + $0x8] sm:$0xff] }
  0x2e   :  { %535 = vmatpush3.msra.mxu1 %v89_v36  ;;  %501 = vmatprep.subr.mxu0 %v72_v37  ;;  %v83_v60 = vld [vmem:[#allocation5 + $0x108] sm:$0xff]  ;;  %v66_v61 = vld [vmem:[#allocation5 + $0x80] sm:$0xff]  ;;  %v44_v1 = vld [vmem:[#allocation2 + $0x8] sm:$0xff] }
  0x2f   :  { %536 = vmatprep.subr.mxu1 %v104_v38  ;;  %502 = vmatpush3.msra.mxu0 %v56_v39  ;;  %v98_v62 = vld [vmem:[#allocation5 + $0x180] sm:$0xff]  ;;  %v43_v4 = vld [vmem:[#allocation2] sm:$0xff]  ;;  %v45_v5 = vld [vmem:[#allocation2 + $0x10] sm:$0xff] }
  0x30   :  { %537 = vmatpush3.msra.mxu1 %v88_v40  ;;  %503 = vmatprep.subr.mxu0 %v71_v41  ;;  %v50_v63 = vld [vmem:[#allocation5] sm:$0xff]  ;;  %v145_v6 = vld [vmem:[#allocation5 + $0x2f8] sm:$0xff]  ;;  %v48_v8 = vld [vmem:[#allocation2 + $0x28] sm:$0xff] }
  0x31   :  { %538 = vmatprep.subr.mxu1 %v103_v42  ;;  %504 = vmatpush3.msra.mxu0 %v55_v43  ;;  %v82_v2 = vld [vmem:[#allocation5 + $0x100] sm:$0xff]  ;;  %v129_v7 = vld [vmem:[#allocation5 + $0x278] sm:$0xff]  ;;  %v144_v9 = vld [vmem:[#allocation5 + $0x2f0] sm:$0xff] }
  0x32   :  { %539 = vmatpush3.msra.mxu1 %v87_v44  ;;  %505 = vmatprep.subr.mxu0 %v70_v45  ;;  %v46_v3 = vld [vmem:[#allocation2 + $0x18] sm:$0xff]  ;;  %v147_v10 = vld [vmem:[#allocation5 + $0x308] sm:$0xff]  ;;  %v128_v11 = vld [vmem:[#allocation5 + $0x270] sm:$0xff] }
  0x33   :  { %540 = vmatprep.subr.mxu1 %v102_v46  ;;  %506 = vmatpush3.msra.mxu0 %v54_v47  ;;  %v143_v12 = vld [vmem:[#allocation5 + $0x2e8] sm:$0xff]  ;;  %v146_v13 = vld [vmem:[#allocation5 + $0x300] sm:$0xff]  ;;  %v49_v16 = vld [vmem:[#allocation2 + $0x30] sm:$0xff] }
  0x34   :  { %541 = vmatpush3.msra.mxu1 %v86_v48  ;;  %507 = vmatprep.subr.mxu0 %v69_v49  ;;  %v127_v14 = vld [vmem:[#allocation5 + $0x268] sm:$0xff]  ;;  %v142_v15 = vld [vmem:[#allocation5 + $0x2e0] sm:$0xff]  ;;  %v141_v18 = vld [vmem:[#allocation5 + $0x2d8] sm:$0xff] }
  0x35   :  { %542 = vmatprep.subr.mxu1 %v101_v50  ;;  %508 = vmatpush3.msra.mxu0 %v53_v51  ;;  %v126_v17 = vld [vmem:[#allocation5 + $0x260] sm:$0xff]  ;;  %v125_v19 = vld [vmem:[#allocation5 + $0x258] sm:$0xff]  ;;  %v140_v20 = vld [vmem:[#allocation5 + $0x2d0] sm:$0xff] }
  0x36   :  { %543 = vmatpush3.msra.mxu1 %v85_v52  ;;  %509 = vmatprep.subr.mxu0 %v68_v53  ;;  %v124_v21 = vld [vmem:[#allocation5 + $0x250] sm:$0xff]  ;;  %v139_v22 = vld [vmem:[#allocation5 + $0x2c8] sm:$0xff]  ;;  %v138_v24 = vld [vmem:[#allocation5 + $0x2c0] sm:$0xff] }
  0x37   :  { %544 = vmatprep.subr.mxu1 %v100_v54  ;;  %510 = vmatpush3.msra.mxu0 %v52_v55  ;;  %v123_v23 = vld [vmem:[#allocation5 + $0x248] sm:$0xff]  ;;  %v122_v25 = vld [vmem:[#allocation5 + $0x240] sm:$0xff]  ;;  %v137_v26 = vld [vmem:[#allocation5 + $0x2b8] sm:$0xff] }
  0x38   :  { %545 = vmatpush3.msra.mxu1 %v84_v56  ;;  %511 = vmatprep.subr.mxu0 %v67_v57  ;;  %v121_v27 = vld [vmem:[#allocation5 + $0x238] sm:$0xff]  ;;  %v120_v28 = vld [vmem:[#allocation5 + $0x230] sm:$0xff]  ;;  %v135_v29 = vld [vmem:[#allocation5 + $0x2a8] sm:$0xff] }
  0x39   :  { %546 = vmatprep.subr.mxu1 %v99_v58  ;;  %512 = vmatpush3.msra.mxu0 %v51_v59  ;;  %v119_v30 = vld [vmem:[#allocation5 + $0x228] sm:$0xff]  ;;  %v134_v31 = vld [vmem:[#allocation5 + $0x2a0] sm:$0xff]  ;;  %v133_v33 = vld [vmem:[#allocation5 + $0x298] sm:$0xff] }
  0x3a   :  { %547 = vmatpush3.msra.mxu1 %v83_v60  ;;  %513 = vmatprep.subr.mxu0 %v66_v61  ;;  %v118_v32 = vld [vmem:[#allocation5 + $0x220] sm:$0xff]  ;;  %v117_v34 = vld [vmem:[#allocation5 + $0x218] sm:$0xff]  ;;  %v132_v35 = vld [vmem:[#allocation5 + $0x290] sm:$0xff] }
  0x3b   :  { %548 = vmatprep.subr.mxu1 %v98_v62  ;;  %514 = vmatpush3.msra.mxu0 %v50_v63  ;;  %v116_v36 = vld [vmem:[#allocation5 + $0x210] sm:$0xff]  ;;  %v131_v37 = vld [vmem:[#allocation5 + $0x288] sm:$0xff]  ;;  %v130_v39 = vld [vmem:[#allocation5 + $0x280] sm:$0xff] }
  0x3c   :  { %216 = vmatprep.mubr.f32.mxu0 %v44_v1  ;;  %549 = vmatpush3.msra.mxu1 %v82_v2  ;;  %v115_v38 = vld [vmem:[#allocation5 + $0x208] sm:$0xff]  ;;  %v114_v40 = vld [vmem:[#allocation5 + $0x200] sm:$0xff] }
  0x3d   :  { %286 = vmatprep.mubr.f32.mxu1 %v46_v3  ;;  %217 = vmatmul.mubr.f32.vlgmr.msra.gmra.mxu0 %v43_v4  ;;  %v47_v41 = vld [vmem:[#allocation2 + $0x20] sm:$0xff] }
  0x3e   :  { %287 = vmatmul.mubr.f32.vlgmr.msra.gmra.mxu1 %v45_v5  ;;  %553 = vmatprep.subr.mxu0 %v145_v6  ;;  %v482_v57 = vld [vmem:[%s739_s2] ss:$0 sm:$0xff] }
  0x3f   :  { %356 = vmatprep.mubr.f32.mxu0 %v48_v8  ;;  %554 = vmatpush3.msra.mxu0 %v129_v7 }
  0x40   :  { %591 = vmatprep.subr.mxu1 %v675_v0  ;;  %555 = vmatprep.subr.mxu0 %v144_v9 }
  0x41   :  { %592 = vmatpush3.msra.mxu1 %v147_v10  ;;  %556 = vmatpush3.msra.mxu0 %v128_v11 }
  0x42   :  { %593 = vmatprep.subr.mxu1 %v675_v0  ;;  %557 = vmatprep.subr.mxu0 %v143_v12 }
  0x43   :  { %594 = vmatpush3.msra.mxu1 %v146_v13  ;;  %558 = vmatpush3.msra.mxu0 %v127_v14 }
  0x44   :  { %595 = vmatprep.mubr.msk.f32.mxu1 %vm676_vm2, %v675_v0  ;;  %559 = vmatprep.subr.mxu0 %v142_v15  ;;  %v136_v0 = vld [vmem:[#allocation5 + $0x2b0] sm:$0xff] }
  0x45   :  { %596 = vmatmul.mubr.msk.f32.vlgmr.msra.gmra.mxu1 %vm148_vm1, %v49_v16  ;;  %560 = vmatpush3.msra.mxu0 %v126_v17 }
  0x46   :  { %561 = vmatprep.subr.mxu0 %v141_v18 }
  0x47   :  { %562 = vmatpush3.msra.mxu0 %v125_v19 }
  0x48   :  { %563 = vmatprep.subr.mxu0 %v140_v20 }
  0x49   :  { %564 = vmatpush3.msra.mxu0 %v124_v21 }
  0x4a   :  { %565 = vmatprep.subr.mxu0 %v139_v22 }
  0x4b   :  { %566 = vmatpush3.msra.mxu0 %v123_v23 }
  0x4c   :  { %567 = vmatprep.subr.mxu0 %v138_v24 }
  0x4d   :  { %568 = vmatpush3.msra.mxu0 %v122_v25 }
  0x4e   :  { %569 = vmatprep.subr.mxu0 %v137_v26 }
  0x4f   :  { %570 = vmatpush3.msra.mxu0 %v121_v27 }
  0x50   :  { %571 = vmatprep.subr.mxu0 %v136_v0 }
  0x51   :  { %572 = vmatpush3.msra.mxu0 %v120_v28 }
  0x52   :  { %573 = vmatprep.subr.mxu0 %v135_v29 }
  0x53   :  { %574 = vmatpush3.msra.mxu0 %v119_v30 }
  0x54   :  { %575 = vmatprep.subr.mxu0 %v134_v31 }
  0x55   :  { %576 = vmatpush3.msra.mxu0 %v118_v32 }
  0x56   :  { %577 = vmatprep.subr.mxu0 %v133_v33 }
  0x57   :  { %578 = vmatpush3.msra.mxu0 %v117_v34 }
  0x58   :  { %579 = vmatprep.subr.mxu0 %v132_v35 }
  0x59   :  { %580 = vmatpush3.msra.mxu0 %v116_v36 }
  0x5a   :  { %581 = vmatprep.subr.mxu0 %v131_v37 }
  0x5b   :  { %582 = vmatpush3.msra.mxu0 %v115_v38 }
  0x5c   :  { %583 = vmatprep.subr.mxu0 %v130_v39 }
  0x5d   :  { %584 = vmatpush3.msra.mxu0 %v114_v40 }
  0x5e   :  { %357 = vmatmul.mubr.f32.vlgmr.msra.gmra.mxu0 %v47_v41 }
  0xfd   :  { %v515_v46 = vpop.f32.mrf.mxu0 }
  0xfe   :  { %v550_v42 = vpop.f32.mrf.mxu1 }
  0xff   :  { %v516_v47 = vpop.f32.mrf.mxu0 }
 0x100   :  { %v551_v43 = vpop.f32.mrf.mxu1  ;;  %v517_v48 = vadd.f32 %v516_v47, %v515_v46 }
 0x101   :  { %v552_v49 = vadd.f32 %v551_v43, %v550_v42 }
 0x103   :  { %v289_v52 = vadd.f32 %v552_v49, %v517_v48 }
 0x105   :  { %v428_v44 = vpop.f32.mrf.mxu1 }
 0x107   :  { %v597_v45 = vpop.f32.mrf.mxu1 }
 0x11e   :  { %v585_v50 = vpop.f32.mrf.mxu0 }
 0x120   :  { %v586_v51 = vpop.f32.mrf.mxu0 }
 0x121   :  { %v587_v53 = vadd.f32 %v586_v51, %v585_v50 }
 0x123   :  { %v359_v54 = vadd.f32 %v587_v53, %v289_v52 }
 0x125   :  { %v429_v55 = vadd.f32 %v428_v44, %v359_v54 }
 0x127   :  { %v432_v56 = vmul.f32 0.035714287, %v429_v55 }
 0x129   :  { %433 = vst [vmem:[#allocation7] sm:$0xff] %v432_v56  ;;  %v434_v58 = vmax.f32 %v432_v56, 0.0 }
 0x12b   :  { %v442_v59 = vmul.f32 %v482_v57, %v434_v58 }
 0x12d   :  { %443 = vadd.xlane.f32.xlu0 %v442_v59 }
 0x12e   :  { %656 = shalt.err (!%p653_p0)
}
 0x12f   :  { %472 = dma.vmem_to_hbm [thread:$0]  %s470_s30, 128, %s741_s4, [#allocation4]   ;;  %v451_v60 = vld [vmem:[%s740_s3] sm:$0xff] }
 0x1b6   :  { %v444_v61 = vpop.xlane.xlu0 %443 }
 0x1b7   :  { %v452_v62 = vadd.f32 %v451_v60, %v444_v61 }
 0x1b9   :  { %454 = vst.msk [vmem:[%s740_s3] sm:$0xff] %vm449_vm0, %v452_v62 }
 0x1c0   :  { %v458_v63 = vld [vmem:[%s740_s3] sm:$0xff] }
 0x1c1   :  { %v459_v1 = vmul.f32 0.17677669, %v458_v63 }
 0x1c3   :  { %460 = vst.msk [vmem:[%s740_s3] sm:$0xff] %vm449_vm0, %v459_v1 }
 0x1c4   :  { %669 = dma.done.wait [#allocation4], 128  }
 0x1c5   :  { %670 = vsyncadd [#allocation4], 4294967168 }
 0x1c6   :  { %478 = vsyncpa [#allocation3], 1 }
 0x1c7   :  { %479 = vsyncpa [#allocation6], 1 }
 0x1c8   :  { %480 = vsyncpa [#allocation4], 1 }

</bundles_post_ra>
